<compile_context>
chip_gen: v7x
topology: tpu7x:2x2x1
jax: 0.10.0
libtpu: 0.0.40
codegen_flags: <defaults>
</compile_context>

<pallas_src>
import functools

import jax
import jax.numpy as jnp
from jax.experimental import pallas as pl
from jax.experimental.pallas import tpu as pltpu

HIDDEN = 14           # hidden_linear out_features
LANES = 128           # vreg lane width
MAX_TILE_ROWS = 2048  # (2048, 128) f32 tile = 1 MiB; in+out double-buffered ~4 MiB
                      # -> fits v5e's 16 MiB default scoped-VMEM limit with headroom.


def _round_up(a, b):
    return ((a + b - 1) // b) * b


def mlp_kernel(x_ref, w1_ref, b1_ref, w2_ref, b2_ref, o_ref, *, compute_dtype):
    """x_ref/o_ref: (tile_rows, 128) f32 VMEM tiles.
    w1_ref/b1_ref/w2_ref: (14,) f32 SMEM; b2_ref: (1,) f32 SMEM.

    Computes b2 + sum_j w2[j] * tanh(w1[j] * x + b1[j]) elementwise.  Pure
    VPU + EUP work (14 tanh/elem is the roofline); scalar SMEM reads splat to
    single replicated vregs so VALU stays just below the EUP.
    """
    cd = compute_dtype
    x = x_ref[...].astype(cd)

    def term(j):
        # Inner FMA + tanh in compute_dtype; the 14-term sum accumulates in f32.
        t = jnp.tanh(x * w1_ref[j].astype(cd) + b1_ref[j].astype(cd))
        return w2_ref[j] * t.astype(jnp.float32)

    # Fold the output bias into the j=0 term: no zeros_like materialization and
    # no extra full-tile add (keeps the kernel EUP-bound, not VALU-bound).
    acc = b2_ref[0] + term(0)
    for j in range(1, HIDDEN):
        acc = acc + term(j)
    o_ref[...] = acc


def subclass_functional_model(x, w1, b1, w2, b2, *, compute_dtype=jnp.float32):
    """Pallas forward pass of SubclassFunctionalModel.

    x : (N, 1) float32
    w1: (14,)  hidden_linear.weight (in_features=1, flattened)
    b1: (14,)  hidden_linear.bias
    w2: (14,)  output_linear.weight (out_features=1, flattened)
    b2: (1,)   output_linear.bias
    compute_dtype: jnp.float32 (default, all chips) or jnp.bfloat16
                   (v6e/v7x only: ~2x EUP throughput, ~1e-3 accuracy).
    returns (N, 1) float32
    """
    n = x.shape[0]
    assert x.shape == (n, 1)

    x_flat = x.reshape(-1)                          # zero-copy
    if x_flat.dtype != jnp.float32:
        x_flat = x_flat.astype(jnp.float32)

    rows = pl.cdiv(n, LANES)
    ragged = (n % LANES) != 0
    if ragged:
        # Only ragged N pays a pad; the hot path (N % 128 == 0) is zero-copy.
        # TODO(synk): a scalar-prefetched length + in-kernel masked store would
        # remove even this pad/slice for ragged N; not worth it here.
        x_slab = jnp.pad(x_flat, (0, rows * LANES - n)).reshape(rows, LANES)
    else:
        x_slab = x_flat.reshape(rows, LANES)        # zero-copy bitcast

    # Adaptive tile: never round `rows` up to a tile multiple (the last grid
    # block may be partial; Pallas masks its out-of-bounds rows).
    if rows > MAX_TILE_ROWS:
        tile_rows = MAX_TILE_ROWS
    elif rows >= 16:
        # Split into >=2 sublane-aligned steps so v7x's two TensorCores both
        # get work via the "parallel" axis below; harmless on v5e/v6e.
        tile_rows = _round_up(pl.cdiv(rows, 2), 8)
    else:
        tile_rows = rows                            # block == full dim (exempt from /8 rule)
    grid = (pl.cdiv(rows, tile_rows),)

    kernel = functools.partial(mlp_kernel, compute_dtype=compute_dtype)
    elems = rows * LANES

    out_slab = pl.pallas_call(
        kernel,
        out_shape=jax.ShapeDtypeStruct((rows, LANES), jnp.float32),
        grid=grid,
        in_specs=[
            pl.BlockSpec((tile_rows, LANES), lambda i: (i, 0)),   # x tiles (VMEM)
            pl.BlockSpec(memory_space=pltpu.MemorySpace.SMEM),    # w1 (14,)
            pl.BlockSpec(memory_space=pltpu.MemorySpace.SMEM),    # b1 (14,)
            pl.BlockSpec(memory_space=pltpu.MemorySpace.SMEM),    # w2 (14,)
            pl.BlockSpec(memory_space=pltpu.MemorySpace.SMEM),    # b2 (1,)
        ],
        out_specs=pl.BlockSpec((tile_rows, LANES), lambda i: (i, 0)),
        compiler_params=pltpu.CompilerParams(
            dimension_semantics=("parallel",)),      # shard rows across v7x's 2 TCs
        cost_estimate=pl.CostEstimate(
            flops=4 * HIDDEN * elems,                # ~56 VALU ops per element
            transcendentals=HIDDEN * elems,          # 14 tanh per element (the roofline)
            bytes_accessed=8 * elems),               # read f32 + write f32
    )(x_slab,
      w1.astype(jnp.float32), b1.astype(jnp.float32),
      w2.astype(jnp.float32), b2.astype(jnp.float32))

    if ragged:
        return out_slab.reshape(-1)[:n].reshape(n, 1)
    return out_slab.reshape(n, 1)                    # zero-copy


def init_params(key):
    """Deterministic init matching nn.Linear(1,14) / Linear(14,1) bounds."""
    k1, k2, k3, k4 = jax.random.split(key, 4)
    bound1 = 1.0                       # 1/sqrt(in_features=1)
    w1 = jax.random.uniform(k1, (HIDDEN,), jnp.float32, -bound1, bound1)
    b1 = jax.random.uniform(k2, (HIDDEN,), jnp.float32, -bound1, bound1)
    bound2 = 1.0 / (HIDDEN ** 0.5)     # 1/sqrt(in_features=14)
    w2 = jax.random.uniform(k3, (HIDDEN,), jnp.float32, -bound2, bound2)
    b2 = jax.random.uniform(k4, (1,), jnp.float32, -bound2, bound2)
    return w1, b1, w2, b2


if __name__ == "__main__":
    key = jax.random.PRNGKey(0)
    kx1, kx2, kp = jax.random.split(key, 3)
    w1, b1, w2, b2 = init_params(kp)

    def ref_fn(xx):
        # Plain-JAX reference: tanh(x @ W1^T + b1) @ W2^T + b2
        return (jnp.tanh(xx @ w1.reshape(1, HIDDEN) + b1[None, :])
                @ w2.reshape(HIDDEN, 1) + b2[0])

    fwd = jax.jit(subclass_functional_model, static_argnames=("compute_dtype",))

    # Small batch of scalar inputs, (N, 1), like the temperature example this
    # module comes from (exercises the ragged-N pad path).
    x8 = jax.random.normal(kx1, (8, 1), jnp.float32)
    out8 = jax.block_until_ready(fwd(x8, w1, b1, w2, b2))
    assert out8.shape == (8, 1)
    assert jnp.allclose(out8, ref_fn(x8), atol=1e-5, rtol=1e-5)

    # Multiple-of-128 batch: exercises the zero-copy (no pad / no slice) path.
    x256 = jax.random.normal(kx2, (256, 1), jnp.float32)
    out256 = jax.block_until_ready(fwd(x256, w1, b1, w2, b2))
    assert out256.shape == (256, 1)
    assert jnp.allclose(out256, ref_fn(x256), atol=1e-5, rtol=1e-5)

    print("KERNEL_OK")
</pallas_src>

<mosaic_0001>
module attributes {stable_mosaic.version = 11 : i64} {
  func.func @mlp_kernel(%arg0: i32, %arg1: memref<1x128xf32, #tpu.memory_space<vmem>>, %arg2: memref<14xf32, #tpu.memory_space<smem>>, %arg3: memref<14xf32, #tpu.memory_space<smem>>, %arg4: memref<14xf32, #tpu.memory_space<smem>>, %arg5: memref<1xf32, #tpu.memory_space<smem>>, %arg6: memref<1x128xf32, #tpu.memory_space<vmem>>) attributes {dimension_semantics = [#tpu.dimension_semantics<parallel>], iteration_bounds = array<i64: 1>, scalar_prefetch = 0 : i64, scratch_operands = 0 : i64, tpu.core_type = #tpu.core_type<tc>, window_params = [{transform_indices = @transform_0, window_bounds = array<i64: 1, 128>}, {transform_indices = @transform_1, window_bounds = array<i64: 14>}, {transform_indices = @transform_2, window_bounds = array<i64: 14>}, {transform_indices = @transform_3, window_bounds = array<i64: 14>}, {transform_indices = @transform_4, window_bounds = array<i64: 1>}, {transform_indices = @transform_5, window_bounds = array<i64: 1, 128>}]} {
    %c0 = arith.constant 0 : index
    %c0_0 = arith.constant 0 : index
    %0 = vector.load %arg1[%c0, %c0_0] : memref<1x128xf32, #tpu.memory_space<vmem>>, vector<1x128xf32>
    %c0_1 = arith.constant 0 : index
    %1 = memref.load %arg5[%c0_1] : memref<1xf32, #tpu.memory_space<smem>>
    %c0_2 = arith.constant 0 : index
    %2 = memref.load %arg2[%c0_2] : memref<14xf32, #tpu.memory_space<smem>>
    %3 = vector.broadcast %2 : f32 to vector<1x128xf32>
    %4 = arith.mulf %0, %3 : vector<1x128xf32>
    %c0_3 = arith.constant 0 : index
    %5 = memref.load %arg3[%c0_3] : memref<14xf32, #tpu.memory_space<smem>>
    %6 = vector.broadcast %5 : f32 to vector<1x128xf32>
    %7 = arith.addf %4, %6 : vector<1x128xf32>
    %8 = math.tanh %7 : vector<1x128xf32>
    %c0_4 = arith.constant 0 : index
    %9 = memref.load %arg4[%c0_4] : memref<14xf32, #tpu.memory_space<smem>>
    %10 = vector.broadcast %9 : f32 to vector<1x128xf32>
    %11 = arith.mulf %10, %8 : vector<1x128xf32>
    %12 = vector.broadcast %1 : f32 to vector<1x128xf32>
    %13 = arith.addf %12, %11 : vector<1x128xf32>
    %c1 = arith.constant 1 : index
    %14 = memref.load %arg2[%c1] : memref<14xf32, #tpu.memory_space<smem>>
    %15 = vector.broadcast %14 : f32 to vector<1x128xf32>
    %16 = arith.mulf %0, %15 : vector<1x128xf32>
    %c1_5 = arith.constant 1 : index
    %17 = memref.load %arg3[%c1_5] : memref<14xf32, #tpu.memory_space<smem>>
    %18 = vector.broadcast %17 : f32 to vector<1x128xf32>
    %19 = arith.addf %16, %18 : vector<1x128xf32>
    %20 = math.tanh %19 : vector<1x128xf32>
    %c1_6 = arith.constant 1 : index
    %21 = memref.load %arg4[%c1_6] : memref<14xf32, #tpu.memory_space<smem>>
    %22 = vector.broadcast %21 : f32 to vector<1x128xf32>
    %23 = arith.mulf %22, %20 : vector<1x128xf32>
    %24 = arith.addf %13, %23 : vector<1x128xf32>
    %c2 = arith.constant 2 : index
    %25 = memref.load %arg2[%c2] : memref<14xf32, #tpu.memory_space<smem>>
    %26 = vector.broadcast %25 : f32 to vector<1x128xf32>
    %27 = arith.mulf %0, %26 : vector<1x128xf32>
    %c2_7 = arith.constant 2 : index
    %28 = memref.load %arg3[%c2_7] : memref<14xf32, #tpu.memory_space<smem>>
    %29 = vector.broadcast %28 : f32 to vector<1x128xf32>
    %30 = arith.addf %27, %29 : vector<1x128xf32>
    %31 = math.tanh %30 : vector<1x128xf32>
    %c2_8 = arith.constant 2 : index
    %32 = memref.load %arg4[%c2_8] : memref<14xf32, #tpu.memory_space<smem>>
    %33 = vector.broadcast %32 : f32 to vector<1x128xf32>
    %34 = arith.mulf %33, %31 : vector<1x128xf32>
    %35 = arith.addf %24, %34 : vector<1x128xf32>
    %c3 = arith.constant 3 : index
    %36 = memref.load %arg2[%c3] : memref<14xf32, #tpu.memory_space<smem>>
    %37 = vector.broadcast %36 : f32 to vector<1x128xf32>
    %38 = arith.mulf %0, %37 : vector<1x128xf32>
    %c3_9 = arith.constant 3 : index
    %39 = memref.load %arg3[%c3_9] : memref<14xf32, #tpu.memory_space<smem>>
    %40 = vector.broadcast %39 : f32 to vector<1x128xf32>
    %41 = arith.addf %38, %40 : vector<1x128xf32>
    %42 = math.tanh %41 : vector<1x128xf32>
    %c3_10 = arith.constant 3 : index
    %43 = memref.load %arg4[%c3_10] : memref<14xf32, #tpu.memory_space<smem>>
    %44 = vector.broadcast %43 : f32 to vector<1x128xf32>
    %45 = arith.mulf %44, %42 : vector<1x128xf32>
    %46 = arith.addf %35, %45 : vector<1x128xf32>
    %c4 = arith.constant 4 : index
    %47 = memref.load %arg2[%c4] : memref<14xf32, #tpu.memory_space<smem>>
    %48 = vector.broadcast %47 : f32 to vector<1x128xf32>
    %49 = arith.mulf %0, %48 : vector<1x128xf32>
    %c4_11 = arith.constant 4 : index
    %50 = memref.load %arg3[%c4_11] : memref<14xf32, #tpu.memory_space<smem>>
    %51 = vector.broadcast %50 : f32 to vector<1x128xf32>
    %52 = arith.addf %49, %51 : vector<1x128xf32>
    %53 = math.tanh %52 : vector<1x128xf32>
    %c4_12 = arith.constant 4 : index
    %54 = memref.load %arg4[%c4_12] : memref<14xf32, #tpu.memory_space<smem>>
    %55 = vector.broadcast %54 : f32 to vector<1x128xf32>
    %56 = arith.mulf %55, %53 : vector<1x128xf32>
    %57 = arith.addf %46, %56 : vector<1x128xf32>
    %c5 = arith.constant 5 : index
    %58 = memref.load %arg2[%c5] : memref<14xf32, #tpu.memory_space<smem>>
    %59 = vector.broadcast %58 : f32 to vector<1x128xf32>
    %60 = arith.mulf %0, %59 : vector<1x128xf32>
    %c5_13 = arith.constant 5 : index
    %61 = memref.load %arg3[%c5_13] : memref<14xf32, #tpu.memory_space<smem>>
    %62 = vector.broadcast %61 : f32 to vector<1x128xf32>
    %63 = arith.addf %60, %62 : vector<1x128xf32>
    %64 = math.tanh %63 : vector<1x128xf32>
    %c5_14 = arith.constant 5 : index
    %65 = memref.load %arg4[%c5_14] : memref<14xf32, #tpu.memory_space<smem>>
    %66 = vector.broadcast %65 : f32 to vector<1x128xf32>
    %67 = arith.mulf %66, %64 : vector<1x128xf32>
    %68 = arith.addf %57, %67 : vector<1x128xf32>
    %c6 = arith.constant 6 : index
    %69 = memref.load %arg2[%c6] : memref<14xf32, #tpu.memory_space<smem>>
    %70 = vector.broadcast %69 : f32 to vector<1x128xf32>
    %71 = arith.mulf %0, %70 : vector<1x128xf32>
    %c6_15 = arith.constant 6 : index
    %72 = memref.load %arg3[%c6_15] : memref<14xf32, #tpu.memory_space<smem>>
    %73 = vector.broadcast %72 : f32 to vector<1x128xf32>
    %74 = arith.addf %71, %73 : vector<1x128xf32>
    %75 = math.tanh %74 : vector<1x128xf32>
    %c6_16 = arith.constant 6 : index
    %76 = memref.load %arg4[%c6_16] : memref<14xf32, #tpu.memory_space<smem>>
    %77 = vector.broadcast %76 : f32 to vector<1x128xf32>
    %78 = arith.mulf %77, %75 : vector<1x128xf32>
    %79 = arith.addf %68, %78 : vector<1x128xf32>
    %c7 = arith.constant 7 : index
    %80 = memref.load %arg2[%c7] : memref<14xf32, #tpu.memory_space<smem>>
    %81 = vector.broadcast %80 : f32 to vector<1x128xf32>
    %82 = arith.mulf %0, %81 : vector<1x128xf32>
    %c7_17 = arith.constant 7 : index
    %83 = memref.load %arg3[%c7_17] : memref<14xf32, #tpu.memory_space<smem>>
    %84 = vector.broadcast %83 : f32 to vector<1x128xf32>
    %85 = arith.addf %82, %84 : vector<1x128xf32>
    %86 = math.tanh %85 : vector<1x128xf32>
    %c7_18 = arith.constant 7 : index
    %87 = memref.load %arg4[%c7_18] : memref<14xf32, #tpu.memory_space<smem>>
    %88 = vector.broadcast %87 : f32 to vector<1x128xf32>
    %89 = arith.mulf %88, %86 : vector<1x128xf32>
    %90 = arith.addf %79, %89 : vector<1x128xf32>
    %c8 = arith.constant 8 : index
    %91 = memref.load %arg2[%c8] : memref<14xf32, #tpu.memory_space<smem>>
    %92 = vector.broadcast %91 : f32 to vector<1x128xf32>
    %93 = arith.mulf %0, %92 : vector<1x128xf32>
    %c8_19 = arith.constant 8 : index
    %94 = memref.load %arg3[%c8_19] : memref<14xf32, #tpu.memory_space<smem>>
    %95 = vector.broadcast %94 : f32 to vector<1x128xf32>
    %96 = arith.addf %93, %95 : vector<1x128xf32>
    %97 = math.tanh %96 : vector<1x128xf32>
    %c8_20 = arith.constant 8 : index
    %98 = memref.load %arg4[%c8_20] : memref<14xf32, #tpu.memory_space<smem>>
    %99 = vector.broadcast %98 : f32 to vector<1x128xf32>
    %100 = arith.mulf %99, %97 : vector<1x128xf32>
    %101 = arith.addf %90, %100 : vector<1x128xf32>
    %c9 = arith.constant 9 : index
    %102 = memref.load %arg2[%c9] : memref<14xf32, #tpu.memory_space<smem>>
    %103 = vector.broadcast %102 : f32 to vector<1x128xf32>
    %104 = arith.mulf %0, %103 : vector<1x128xf32>
    %c9_21 = arith.constant 9 : index
    %105 = memref.load %arg3[%c9_21] : memref<14xf32, #tpu.memory_space<smem>>
    %106 = vector.broadcast %105 : f32 to vector<1x128xf32>
    %107 = arith.addf %104, %106 : vector<1x128xf32>
    %108 = math.tanh %107 : vector<1x128xf32>
    %c9_22 = arith.constant 9 : index
    %109 = memref.load %arg4[%c9_22] : memref<14xf32, #tpu.memory_space<smem>>
    %110 = vector.broadcast %109 : f32 to vector<1x128xf32>
    %111 = arith.mulf %110, %108 : vector<1x128xf32>
    %112 = arith.addf %101, %111 : vector<1x128xf32>
    %c10 = arith.constant 10 : index
    %113 = memref.load %arg2[%c10] : memref<14xf32, #tpu.memory_space<smem>>
    %114 = vector.broadcast %113 : f32 to vector<1x128xf32>
    %115 = arith.mulf %0, %114 : vector<1x128xf32>
    %c10_23 = arith.constant 10 : index
    %116 = memref.load %arg3[%c10_23] : memref<14xf32, #tpu.memory_space<smem>>
    %117 = vector.broadcast %116 : f32 to vector<1x128xf32>
    %118 = arith.addf %115, %117 : vector<1x128xf32>
    %119 = math.tanh %118 : vector<1x128xf32>
    %c10_24 = arith.constant 10 : index
    %120 = memref.load %arg4[%c10_24] : memref<14xf32, #tpu.memory_space<smem>>
    %121 = vector.broadcast %120 : f32 to vector<1x128xf32>
    %122 = arith.mulf %121, %119 : vector<1x128xf32>
    %123 = arith.addf %112, %122 : vector<1x128xf32>
    %c11 = arith.constant 11 : index
    %124 = memref.load %arg2[%c11] : memref<14xf32, #tpu.memory_space<smem>>
    %125 = vector.broadcast %124 : f32 to vector<1x128xf32>
    %126 = arith.mulf %0, %125 : vector<1x128xf32>
    %c11_25 = arith.constant 11 : index
    %127 = memref.load %arg3[%c11_25] : memref<14xf32, #tpu.memory_space<smem>>
    %128 = vector.broadcast %127 : f32 to vector<1x128xf32>
    %129 = arith.addf %126, %128 : vector<1x128xf32>
    %130 = math.tanh %129 : vector<1x128xf32>
    %c11_26 = arith.constant 11 : index
    %131 = memref.load %arg4[%c11_26] : memref<14xf32, #tpu.memory_space<smem>>
    %132 = vector.broadcast %131 : f32 to vector<1x128xf32>
    %133 = arith.mulf %132, %130 : vector<1x128xf32>
    %134 = arith.addf %123, %133 : vector<1x128xf32>
    %c12 = arith.constant 12 : index
    %135 = memref.load %arg2[%c12] : memref<14xf32, #tpu.memory_space<smem>>
    %136 = vector.broadcast %135 : f32 to vector<1x128xf32>
    %137 = arith.mulf %0, %136 : vector<1x128xf32>
    %c12_27 = arith.constant 12 : index
    %138 = memref.load %arg3[%c12_27] : memref<14xf32, #tpu.memory_space<smem>>
    %139 = vector.broadcast %138 : f32 to vector<1x128xf32>
    %140 = arith.addf %137, %139 : vector<1x128xf32>
    %141 = math.tanh %140 : vector<1x128xf32>
    %c12_28 = arith.constant 12 : index
    %142 = memref.load %arg4[%c12_28] : memref<14xf32, #tpu.memory_space<smem>>
    %143 = vector.broadcast %142 : f32 to vector<1x128xf32>
    %144 = arith.mulf %143, %141 : vector<1x128xf32>
    %145 = arith.addf %134, %144 : vector<1x128xf32>
    %c13 = arith.constant 13 : index
    %146 = memref.load %arg2[%c13] : memref<14xf32, #tpu.memory_space<smem>>
    %147 = vector.broadcast %146 : f32 to vector<1x128xf32>
    %148 = arith.mulf %0, %147 : vector<1x128xf32>
    %c13_29 = arith.constant 13 : index
    %149 = memref.load %arg3[%c13_29] : memref<14xf32, #tpu.memory_space<smem>>
    %150 = vector.broadcast %149 : f32 to vector<1x128xf32>
    %151 = arith.addf %148, %150 : vector<1x128xf32>
    %152 = math.tanh %151 : vector<1x128xf32>
    %c13_30 = arith.constant 13 : index
    %153 = memref.load %arg4[%c13_30] : memref<14xf32, #tpu.memory_space<smem>>
    %154 = vector.broadcast %153 : f32 to vector<1x128xf32>
    %155 = arith.mulf %154, %152 : vector<1x128xf32>
    %156 = arith.addf %145, %155 : vector<1x128xf32>
    %c0_31 = arith.constant 0 : index
    %c0_32 = arith.constant 0 : index
    %157 = vector.load %arg6[%c0_31, %c0_32] : memref<1x128xf32, #tpu.memory_space<vmem>>, vector<1x128xf32>
    tpu.vector_store %arg6[%c0_31, %c0_32], %156 {strides = array<i32>} : memref<1x128xf32, #tpu.memory_space<vmem>>, vector<1x128xf32>,
    return
  }
  func.func @transform_0(%arg0: i32) -> (i32, i32) {
    %c0_i32 = arith.constant 0 : i32
    %c0_i32_0 = arith.constant 0 : i32
    return %arg0, %c0_i32 : i32, i32
  }
  func.func @transform_1(%arg0: i32) -> i32 {
    %c0_i32 = arith.constant 0 : i32
    %c0_i32_0 = arith.constant 0 : i32
    return %c0_i32 : i32
  }
  func.func @transform_2(%arg0: i32) -> i32 {
    %c0_i32 = arith.constant 0 : i32
    %c0_i32_0 = arith.constant 0 : i32
    return %c0_i32 : i32
  }
  func.func @transform_3(%arg0: i32) -> i32 {
    %c0_i32 = arith.constant 0 : i32
    %c0_i32_0 = arith.constant 0 : i32
    return %c0_i32 : i32
  }
  func.func @transform_4(%arg0: i32) -> i32 {
    %c0_i32 = arith.constant 0 : i32
    %c0_i32_0 = arith.constant 0 : i32
    return %c0_i32 : i32
  }
  func.func @transform_5(%arg0: i32) -> (i32, i32) {
    %c0_i32 = arith.constant 0 : i32
    %c0_i32_0 = arith.constant 0 : i32
    return %arg0, %c0_i32 : i32, i32
  }
}

</mosaic_0001>

<bundles_post_ra>
// kernel: subclass_functional_model.1
= control target key start
LH: loop header
LB: loop body
LE: loop exit
PB: predicated region body
PF: predicated region fallthrough
CT: control target
= control target key end

     0   :  { %11 = vsyncpa [#allocation4], 0  ;;  %s497_s0 = inlined_call_operand.vmem [shape: f32[1,128], index: 0, kind: input, shape index: {}]   ;;  %s498_s1 = inlined_call_operand.vmem [shape: f32[14], index: 1, kind: input, shape index: {}]   ;;  %s499_s2 = inlined_call_operand.vmem [shape: f32[14], index: 2, kind: input, shape index: {}]   ;;  %s500_s3 = inlined_call_operand.vmem [shape: f32[14], index: 3, kind: input, shape index: {}]   ;;  %s501_s4 = inlined_call_operand.<no memory space> [shape: f32[1], index: 4, kind: input, shape index: {}]   ;;  %s502_s5 = inlined_call_operand.vmem [shape: f32[1,128], index: 5, kind: output, shape index: {}]  }
   0x1   :  { %12 = vsyncpa [#allocation6], 0  ;;  %s31_s20 = sshll.u32 %s499_s2, 4  ;;  %s21_s23 = sshll.u32 %s498_s1, 4  ;;  %s32_s20 = int_to_ptr.vmem [resolvable:$true] %s31_s20  ;;  %s22_s23 = int_to_ptr.vmem [resolvable:$true] %s21_s23 }
   0x2   :  { %s291_s24 = scalar_lea.vmem %s32_s20, 16  ;;  %p296_p1 = scmp.lt.s32.totalorder %s32_s20, %s32_s20 }
   0x3   :  { %p292_p0 = scmp.ne.s32.totalorder %s32_s20, %s291_s24  ;;  %p297_p2 = scmp.lt.s32.totalorder %s291_s24, %s291_s24 }
   0x5   :  { %p298_p3 = por %p297_p2, %p296_p1 }
   0x7   :  { %p299_p4 = pnand %p298_p3, %p292_p0 }
   0x9   :  { %302 = shalt.err (!%p299_p4)
}
   0xa   :  { %s331_s25 = smov [#allocation5]   ;;  %s303_s26 = scalar_lea.vmem %s22_s23, 16 }
   0xb   :  { %34 = dma.vmem_to_smem %s32_s20, 16, %s331_s25, [#allocation6]  }
   0xc   :  { %p304_p5 = scmp.ne.s32.totalorder %s22_s23, %s303_s26  ;;  %p308_p6 = scmp.lt.s32.totalorder %s22_s23, %s22_s23 }
   0xd   :  { %p309_p7 = scmp.lt.s32.totalorder %s303_s26, %s303_s26 }
   0xf   :  { %p310_p8 = por %p309_p7, %p308_p6 }
  0x11   :  { %p311_p9 = pnand %p310_p8, %p304_p5 }
  0x13   :  { %314 = shalt.err (!%p311_p9)
}
  0x14   :  { %s332_s2 = smov [#allocation3]   ;;  %s41_s28 = sshll.u32 %s500_s3, 4  ;;  %s42_s28 = int_to_ptr.vmem [resolvable:$true] %s41_s28 }
  0x15   :  { %24 = dma.vmem_to_smem %s22_s23, 16, %s332_s2, [#allocation4]  }
  0x16   :  { %s315_s29 = scalar_lea.vmem %s42_s28, 16  ;;  %p320_p11 = scmp.lt.s32.totalorder %s42_s28, %s42_s28 }
  0x17   :  { %p316_p10 = scmp.ne.s32.totalorder %s42_s28, %s315_s29  ;;  %p321_p12 = scmp.lt.s32.totalorder %s315_s29, %s315_s29 }
  0x19   :  { %p322_p13 = por %p321_p12, %p320_p11 }
  0x1b   :  { %p323_p0 = pnand %p322_p13, %p316_p10 }
  0x1d   :  { %326 = shalt.err (!%p323_p0)
}
  0x1e   :  { %s333_s30 = smov [#allocation7]  }
  0x1f   :  { %44 = dma.vmem_to_smem %s42_s28, 16, %s333_s30, [#allocation6]  }
  0x20   :  { %327 = dma.done.wait [#allocation4], 16  }
  0x21   :  { %328 = vsyncadd [#allocation4], 4294967280 }
  0x22   :  { %329 = dma.done.wait [#allocation6], 32  }
  0x23   :  { %330 = vsyncadd [#allocation6], 4294967264 }
  0x24   :  { %56 = sfence }
  0x25   :  { %s59_s6 = sld [smem:[#allocation3]]  ;;  %s221_s8 = sld [smem:[#allocation3 + $0x1]]  ;;  %v378_v0 = vld [vmem:[%s497_s0] sm:$0x1]  ;;  %v69_v26 = vstv %s501_s4 }
  0x26   :  { %s62_s7 = sld [smem:[#allocation5]]  ;;  %s222_s9 = sld [smem:[#allocation5 + $0x1]] }
  0x27   :  { %s224_s3 = sld [smem:[#allocation3 + $0x2]]  ;;  %s227_s13 = sld [smem:[#allocation3 + $0x3]] }
  0x28   :  { %s373_s10 = sld [smem:[#allocation5 + $0x2]]  ;;  %s380_s14 = sld [smem:[#allocation5 + $0x3]] }
  0x29   :  { %s382_s15 = sld [smem:[#allocation3 + $0x4]]  ;;  %s387_s17 = sld [smem:[#allocation3 + $0x5]] }
  0x2a   :  { %s384_s16 = sld [smem:[#allocation5 + $0x4]]  ;;  %s389_s18 = sld [smem:[#allocation7]] }
  0x2b   :  { %v60_v1 = vstv %s59_s6  ;;  %v72_v4 = vstv %s221_s8  ;;  %s392_s0 = sld [smem:[#allocation5 + $0x5]]  ;;  %s395_s19 = sld [smem:[#allocation3 + $0x6]] }
  0x2c   :  { %v63_v2 = vstv %s62_s7  ;;  %v61_v3 = vmul.f32 %v60_v1, %v378_v0  ;;  %v73_v5 = vmul.f32 %v72_v4, %v378_v0  ;;  %v75_v6 = vstv %s222_s9  ;;  %s397_s20 = sld [smem:[#allocation5 + $0x6]]  ;;  %s399_s21 = sld [smem:[#allocation7 + $0x1]] }
  0x2d   :  { %v83_v8 = vstv %s224_s3  ;;  %v94_v12 = vstv %s227_s13  ;;  %s402_s22 = sld [smem:[#allocation3 + $0x7]]  ;;  %s404_s23 = sld [smem:[#allocation7 + $0x2]] }
  0x2e   :  { %v64_v7 = vadd.f32 %v63_v2, %v61_v3  ;;  %v86_v9 = vstv %s373_s10  ;;  %v76_v10 = vadd.f32 %v75_v6, %v73_v5  ;;  %v84_v11 = vmul.f32 %v83_v8, %v378_v0  ;;  %s408_s24 = sld [smem:[#allocation5 + $0x7]]  ;;  %s412_s25 = sld [smem:[#allocation3 + $0x8]] }
  0x2f   :  { %v95_v13 = vmul.f32 %v94_v12, %v378_v0  ;;  %v97_v14 = vstv %s380_s14  ;;  %v105_v16 = vstv %s382_s15  ;;  %s414_s26 = sld [smem:[#allocation5 + $0x8]]  ;;  %v116_v20 = vstv %s387_s17  ;;  %s418_s2 = sld [smem:[#allocation3 + $0x9]] }
  0x30   :  { %263 = vtanh.f32 %v64_v7  ;;  %v87_v15 = vadd.f32 %v86_v9, %v84_v11  ;;  %v108_v17 = vstv %s384_s16  ;;  %v106_v19 = vmul.f32 %v105_v16, %v378_v0  ;;  %s420_s1 = sld [smem:[#allocation7 + $0x3]]  ;;  %s424_s27 = sld [smem:[#allocation5 + $0x9]] }
  0x31   :  { %265 = vtanh.f32 %v76_v10  ;;  %v98_v18 = vadd.f32 %v97_v14, %v95_v13  ;;  %v117_v21 = vmul.f32 %v116_v20, %v378_v0  ;;  %v119_v22 = vstv %s392_s0  ;;  %s428_s28 = sld [smem:[#allocation3 + $0xa]]  ;;  %s435_s7 = sld [smem:[#allocation7 + $0x4]] }
  0x32   :  { %267 = vtanh.f32 %v87_v15  ;;  %v109_v23 = vadd.f32 %v108_v17, %v106_v19  ;;  %v127_v24 = vstv %s395_s19  ;;  %v130_v25 = vstv %s397_s20  ;;  %s430_s29 = sld [smem:[#allocation5 + $0xa]]  ;;  %s439_s8 = sld [smem:[#allocation3 + $0xb]] }
  0x33   :  { %269 = vtanh.f32 %v98_v18  ;;  %v120_v27 = vadd.f32 %v119_v22, %v117_v21  ;;  %v128_v28 = vmul.f32 %v127_v24, %v378_v0  ;;  %v138_v29 = vstv %s402_s22  ;;  %s442_s9 = sld [smem:[#allocation7 + $0x5]]  ;;  %s446_s4 = sld [smem:[#allocation5 + $0xb]] }
  0x34   :  { %v67_v30 = vstv %s389_s18  ;;  %271 = vtanh.f32 %v109_v23  ;;  %v139_v31 = vmul.f32 %v138_v29, %v378_v0  ;;  %v141_v32 = vstv %s408_s24  ;;  %s450_s3 = sld [smem:[#allocation3 + $0xc]]  ;;  %s457_s11 = sld [smem:[#allocation3 + $0xd]] }
  0x35   :  { %273 = vtanh.f32 %v120_v27  ;;  %v131_v33 = vadd.f32 %v130_v25, %v128_v28  ;;  %v149_v34 = vstv %s412_s25  ;;  %v152_v35 = vstv %s414_s26  ;;  %s452_s10 = sld [smem:[#allocation5 + $0xc]]  ;;  %s462_s12 = sld [smem:[#allocation5 + $0xd]] }
  0x36   :  { %v79_v36 = vstv %s399_s21  ;;  %v142_v37 = vadd.f32 %v141_v32, %v139_v31  ;;  %v150_v38 = vmul.f32 %v149_v34, %v378_v0  ;;  %v160_v39 = vstv %s418_s2  ;;  %s464_s13 = sld [smem:[#allocation7 + $0x6]]  ;;  %s470_s14 = sld [smem:[#allocation7 + $0x7]] }
  0x37   :  { %v90_v40 = vstv %s404_s23  ;;  %275 = vtanh.f32 %v131_v33  ;;  %v161_v41 = vmul.f32 %v160_v39, %v378_v0  ;;  %v163_v42 = vstv %s424_s27  ;;  %s477_s15 = sld [smem:[#allocation7 + $0x8]]  ;;  %s481_s16 = sld [smem:[#allocation7 + $0x9]] }
  0x38   :  { %277 = vtanh.f32 %v142_v37  ;;  %v153_v44 = vadd.f32 %v152_v35, %v150_v38  ;;  %v171_v45 = vstv %s428_s28  ;;  %v174_v46 = vstv %s430_s29  ;;  %s488_s17 = sld [smem:[#allocation7 + $0xa]]  ;;  %s253_s18 = sld [smem:[#allocation7 + $0xb]] }
  0x39   :  { %v101_v49 = vstv %s420_s1  ;;  %v164_v50 = vadd.f32 %v163_v42, %v161_v41  ;;  %v172_v51 = vmul.f32 %v171_v45, %v378_v0  ;;  %v182_v53 = vstv %s439_s8  ;;  %s256_s0 = sld [smem:[#allocation7 + $0xc]]  ;;  %s259_s19 = sld [smem:[#allocation7 + $0xd]] }
  0x3a   :  { %v264_v43 = vpop.eup %263  ;;  %279 = vtanh.f32 %v153_v44  ;;  %v185_v54 = vstv %s446_s4  ;;  %v112_v57 = vstv %s435_s7  ;;  %v183_v59 = vmul.f32 %v182_v53, %v378_v0 }
  0x3b   :  { %v266_v47 = vpop.eup %265  ;;  %v68_v48 = vmul.f32 %v264_v43, %v67_v30  ;;  %v175_v58 = vadd.f32 %v174_v46, %v172_v51  ;;  %v123_v62 = vstv %s442_s9  ;;  %281 = vtanh.f32 %v164_v50 }
  0x3c   :  { %v80_v52 = vmul.f32 %v266_v47, %v79_v36  ;;  %v268_v55 = vpop.eup %267  ;;  %v193_v63 = vstv %s450_s3  ;;  %v186_v3 = vadd.f32 %v185_v54, %v183_v59  ;;  %v196_v4 = vstv %s452_s10 }
  0x3d   :  { %v70_v56 = vadd.f32 %v69_v26, %v68_v48  ;;  %v270_v60 = vpop.eup %269  ;;  %v91_v61 = vmul.f32 %v268_v55, %v90_v40  ;;  %283 = vtanh.f32 %v175_v58  ;;  %v194_v6 = vmul.f32 %v193_v63, %v378_v0 }
  0x3e   :  { %v102_v2 = vmul.f32 %v270_v60, %v101_v49  ;;  %v272_v5 = vpop.eup %271  ;;  %v204_v7 = vstv %s457_s11  ;;  %v207_v8 = vstv %s462_s12  ;;  %v134_v13 = vstv %s464_s13 }
  0x3f   :  { %v81_v1 = vadd.f32 %v80_v52, %v70_v56  ;;  %v274_v9 = vpop.eup %273  ;;  %v113_v11 = vmul.f32 %v272_v5, %v112_v57  ;;  %v205_v12 = vmul.f32 %v204_v7, %v378_v0  ;;  %285 = vtanh.f32 %v186_v3 }
  0x40   :  { %v197_v14 = vadd.f32 %v196_v4, %v194_v6  ;;  %v124_v17 = vmul.f32 %v274_v9, %v123_v62  ;;  %v145_v20 = vstv %s470_s14  ;;  %v156_v0 = vstv %s477_s15 }
  0x41   :  { %v92_v10 = vadd.f32 %v91_v61, %v81_v1  ;;  %v276_v15 = vpop.eup %275  ;;  %v208_v18 = vadd.f32 %v207_v8, %v205_v12  ;;  %v167_v27 = vstv %s481_s16  ;;  %v178_v31 = vstv %s488_s17 }
  0x42   :  { %v278_v19 = vpop.eup %277  ;;  %287 = vtanh.f32 %v197_v14  ;;  %v135_v22 = vmul.f32 %v276_v15, %v134_v13  ;;  %v189_v35 = vstv %s253_s18  ;;  %v200_v39 = vstv %s256_s0 }
  0x43   :  { %v103_v16 = vadd.f32 %v102_v2, %v92_v10  ;;  %289 = vtanh.f32 %v208_v18  ;;  %v146_v25 = vmul.f32 %v278_v19, %v145_v20  ;;  %v211_v43 = vstv %s259_s19 }
  0x44   :  { %v280_v23 = vpop.eup %279 }
  0x45   :  { %v114_v21 = vadd.f32 %v113_v11, %v103_v16  ;;  %v282_v26 = vpop.eup %281  ;;  %v157_v29 = vmul.f32 %v280_v23, %v156_v0 }
  0x46   :  { %v168_v33 = vmul.f32 %v282_v26, %v167_v27 }
  0x47   :  { %v125_v24 = vadd.f32 %v124_v17, %v114_v21  ;;  %v284_v30 = vpop.eup %283 }
  0x48   :  { %v179_v37 = vmul.f32 %v284_v30, %v178_v31 }
  0x49   :  { %v136_v28 = vadd.f32 %v135_v22, %v125_v24  ;;  %v286_v34 = vpop.eup %285 }
  0x4a   :  { %v190_v41 = vmul.f32 %v286_v34, %v189_v35 }
  0x4b   :  { %v147_v32 = vadd.f32 %v146_v25, %v136_v28 }
  0x4c   :  { %v288_v38 = vpop.eup %287 }
  0x4d   :  { %v158_v36 = vadd.f32 %v157_v29, %v147_v32  ;;  %v290_v42 = vpop.eup %289  ;;  %v201_v45 = vmul.f32 %v288_v38, %v200_v39 }
  0x4e   :  { %v212_v47 = vmul.f32 %v290_v42, %v211_v43 }
  0x4f   :  { %v169_v40 = vadd.f32 %v168_v33, %v158_v36 }
  0x51   :  { %v180_v44 = vadd.f32 %v179_v37, %v169_v40 }
  0x53   :  { %v191_v46 = vadd.f32 %v190_v41, %v180_v44 }
  0x55   :  { %v202_v48 = vadd.f32 %v201_v45, %v191_v46 }
  0x57   :  { %v213_v49 = vadd.f32 %v212_v47, %v202_v48 }
  0x59   :  { %214 = vst [vmem:[%s502_s5] sm:$0x1] %v213_v49 }
  0x5a   :  { %219 = vsyncpa [#allocation4], 1 }
  0x5b   :  { %220 = vsyncpa [#allocation6], 1 }

</bundles_post_ra>
